<compile_context>
chip_gen: v7x
topology: tpu7x:2x2x1
jax: 0.10.0
libtpu: 0.0.40
codegen_flags: <defaults>
</compile_context>

<pallas_src>
import jax
import jax.numpy as jnp
from jax.experimental import pallas as pl
from jax.experimental.pallas import tpu as pltpu


def classifier_kernel(
    kp_ref, imgf_ref,
    w3_ref, b3_ref,
    w4_ref, b4_ref,
    w6_ref, b6_ref,
    w8kp_ref, wimg_ref, bout_ref,
    out_ref,
):
    f32 = jnp.float32

    # --- keypoint MLP chain (dropout2d = identity in eval mode) ---
    h = jnp.dot(kp_ref[...], w3_ref[...], preferred_element_type=f32) + b3_ref[...]
    h = jnp.maximum(h, 0.0)
    h = jnp.dot(h, w4_ref[...], preferred_element_type=f32) + b4_ref[...]
    h = jnp.maximum(h, 0.0)
    h = jnp.dot(h, w6_ref[...], preferred_element_type=f32) + b6_ref[...]
    h = jnp.maximum(h, 0.0)

    # --- fused concat + ln8 (backbone stub folded into the image branch) ---
    logits = (
        jnp.dot(h, w8kp_ref[...], preferred_element_type=f32)
        + jnp.dot(imgf_ref[...], wimg_ref[...], preferred_element_type=f32)
        + bout_ref[...]
    )

    # --- softmax over last dim (nn.Softmax default on 2-D input -> dim=1) ---
    m = jnp.max(logits, axis=-1, keepdims=True)
    e = jnp.exp(logits - m)
    denom = jnp.sum(e, axis=-1, keepdims=True)
    out_ref[...] = (e * pl.reciprocal(denom, approx=True)).astype(out_ref.dtype)


def classifier_forward(kp, img, fused, *, block_b=256):
    """kp: (B, 42) f32, img: (B, 3, 16, 16) f32 (NCHW). Returns (B, 8) f32."""
    B = kp.shape[0]
    img_flat = img.reshape(B, -1)  # (B, 768), same flatten order as torch .view

    # Batch tiling: only tile when B divides cleanly into block_b; tiny/ragged
    # batches run as a single grid step (per-step overhead would dominate).
    if B % block_b != 0:
        block_b = B
    nb = B // block_b

    weights = (
        fused["w3"], fused["b3"],
        fused["w4"], fused["b4"],
        fused["w6"], fused["b6"],
        fused["w8kp"], fused["w_img"], fused["b_out"],
    )

    def batch_spec(cols):
        return pl.BlockSpec((block_b, cols), lambda i: (i, 0))

    def resident_spec(shape):
        # Constant block index -> weight stays VMEM-resident across grid steps.
        return pl.BlockSpec(shape, lambda i: (0, 0))

    in_specs = [batch_spec(kp.shape[1]), batch_spec(img_flat.shape[1])]
    in_specs += [resident_spec(w.shape) for w in weights]

    args = (kp, img_flat) + weights
    flops = 2 * B * (42 * 64 + 64 * 64 + 64 * 64 + 64 * 8 + 768 * 8)
    bytes_accessed = sum(int(a.size) * a.dtype.itemsize for a in args) + B * 8 * 4

    return pl.pallas_call(
        classifier_kernel,
        out_shape=jax.ShapeDtypeStruct((B, 8), jnp.float32),
        grid=(nb,),
        in_specs=in_specs,
        out_specs=pl.BlockSpec((block_b, 8), lambda i: (i, 0)),
        compiler_params=pltpu.CompilerParams(dimension_semantics=("parallel",)),
        cost_estimate=pl.CostEstimate(
            flops=flops, transcendentals=9 * B, bytes_accessed=bytes_accessed
        ),
    )(*args)


def _uniform(key, shape, fan_in):
    # Mimic PyTorch nn.Linear default init: U(-1/sqrt(fan_in), 1/sqrt(fan_in)).
    bound = 1.0 / jnp.sqrt(jnp.float32(fan_in))
    return jax.random.uniform(key, shape, jnp.float32, -bound, bound)


def init_params(key):
    ks = jax.random.split(key, 10)
    params = {
        # densenet201 stub: flattened img (768) -> 1000 features
        "wstub": _uniform(ks[0], (768, 1000), 768),
        "bstub": _uniform(ks[1], (1, 1000), 768),
        # ln3: 42 -> 64
        "w3": _uniform(ks[2], (42, 64), 42),
        "b3": _uniform(ks[3], (1, 64), 42),
        # ln4: 64 -> 64
        "w4": _uniform(ks[4], (64, 64), 64),
        "b4": _uniform(ks[5], (1, 64), 64),
        # ln6: 64 -> 64
        "w6": _uniform(ks[6], (64, 64), 64),
        "b6": _uniform(ks[7], (1, 64), 64),
        # ln8: 1064 -> 8, split into kp-part (first 64 rows) and img-part (last 1000)
        "b8": _uniform(ks[9], (1, 8), 1064),
    }
    w8_full = _uniform(ks[8], (1064, 8), 1064)
    params["w8kp"] = w8_full[:64, :]
    params["w8img"] = w8_full[64:, :]
    return params


def fuse_params(params):
    """Fold the linear backbone stub into the head. Done once, outside the kernel."""
    w_img = params["wstub"] @ params["w8img"]                 # (768, 8)
    b_out = params["b8"] + params["bstub"] @ params["w8img"]  # (1, 8)
    return {
        "w3": params["w3"], "b3": params["b3"],
        "w4": params["w4"], "b4": params["b4"],
        "w6": params["w6"], "b6": params["b6"],
        "w8kp": params["w8kp"],
        "w_img": w_img, "b_out": b_out,
    }


def reference_forward(kp, img, params):
    """Pure-JAX reference using the UNFUSED two-stage path (backbone stub -> head)."""
    B = kp.shape[0]
    img_feat = img.reshape(B, -1) @ params["wstub"] + params["bstub"]
    h = jnp.maximum(kp @ params["w3"] + params["b3"], 0.0)
    h = jnp.maximum(h @ params["w4"] + params["b4"], 0.0)
    h = jnp.maximum(h @ params["w6"] + params["b6"], 0.0)
    logits = h @ params["w8kp"] + img_feat @ params["w8img"] + params["b8"]
    return jax.nn.softmax(logits, axis=-1)


if __name__ == "__main__":
    key = jax.random.PRNGKey(0)
    k_params, k_kp, k_img = jax.random.split(key, 3)

    params = init_params(k_params)
    fused = fuse_params(params)

    B = 2
    kp = jax.random.normal(k_kp, (B, 42), jnp.float32)
    img = jax.random.normal(k_img, (B, 3, 16, 16), jnp.float32)  # NCHW

    out = classifier_forward(kp, img, fused)
    out = jax.block_until_ready(out)

    ref = reference_forward(kp, img, params)
    assert out.shape == (B, 8)
    # approx reciprocal in the softmax introduces ~2^-12 relative error -> 1e-3 tolerances.
    assert jnp.allclose(jnp.sum(out, axis=-1), 1.0, atol=2e-3)
    assert jnp.allclose(out, ref, atol=1e-3, rtol=1e-3)

    print("KERNEL_OK")
</pallas_src>

<mosaic_0001>
module attributes {stable_mosaic.version = 11 : i64} {
  func.func @classifier_kernel(%arg0: i32, %arg1: memref<2x42xf32, #tpu.memory_space<vmem>>, %arg2: memref<2x768xf32, #tpu.memory_space<vmem>>, %arg3: memref<42x64xf32, #tpu.memory_space<vmem>>, %arg4: memref<1x64xf32, #tpu.memory_space<vmem>>, %arg5: memref<64x64xf32, #tpu.memory_space<vmem>>, %arg6: memref<1x64xf32, #tpu.memory_space<vmem>>, %arg7: memref<64x64xf32, #tpu.memory_space<vmem>>, %arg8: memref<1x64xf32, #tpu.memory_space<vmem>>, %arg9: memref<64x8xf32, #tpu.memory_space<vmem>>, %arg10: memref<768x8xf32, #tpu.memory_space<vmem>>, %arg11: memref<1x8xf32, #tpu.memory_space<vmem>>, %arg12: memref<2x8xf32, #tpu.memory_space<vmem>>) attributes {dimension_semantics = [#tpu.dimension_semantics<parallel>], iteration_bounds = array<i64: 1>, scalar_prefetch = 0 : i64, scratch_operands = 0 : i64, tpu.core_type = #tpu.core_type<tc>, window_params = [{transform_indices = @transform_0, window_bounds = array<i64: 2, 42>}, {transform_indices = @transform_1, window_bounds = array<i64: 2, 768>}, {pipeline_mode = #tpu.pipeline_mode<synchronous>, transform_indices = @transform_2, window_bounds = array<i64: 42, 64>}, {pipeline_mode = #tpu.pipeline_mode<synchronous>, transform_indices = @transform_3, window_bounds = array<i64: 1, 64>}, {pipeline_mode = #tpu.pipeline_mode<synchronous>, transform_indices = @transform_4, window_bounds = array<i64: 64, 64>}, {pipeline_mode = #tpu.pipeline_mode<synchronous>, transform_indices = @transform_5, window_bounds = array<i64: 1, 64>}, {pipeline_mode = #tpu.pipeline_mode<synchronous>, transform_indices = @transform_6, window_bounds = array<i64: 64, 64>}, {pipeline_mode = #tpu.pipeline_mode<synchronous>, transform_indices = @transform_7, window_bounds = array<i64: 1, 64>}, {pipeline_mode = #tpu.pipeline_mode<synchronous>, transform_indices = @transform_8, window_bounds = array<i64: 64, 8>}, {pipeline_mode = #tpu.pipeline_mode<synchronous>, transform_indices = @transform_9, window_bounds = array<i64: 768, 8>}, {pipeline_mode = #tpu.pipeline_mode<synchronous>, transform_indices = @transform_10, window_bounds = array<i64: 1, 8>}, {transform_indices = @transform_11, window_bounds = array<i64: 2, 8>}]} {
    %c0 = arith.constant 0 : index
    %c0_0 = arith.constant 0 : index
    %0 = vector.load %arg1[%c0, %c0_0] : memref<2x42xf32, #tpu.memory_space<vmem>>, vector<2x42xf32>
    %c0_1 = arith.constant 0 : index
    %c0_2 = arith.constant 0 : index
    %1 = vector.load %arg3[%c0_1, %c0_2] : memref<42x64xf32, #tpu.memory_space<vmem>>, vector<42x64xf32>
    %cst = arith.constant dense<0.000000e+00> : vector<2x64xf32>
    %2 = tpu.matmul %0, %1, %cst {dimension_numbers = #tpu.dot_dimension_numbers<[1], [0], [0], [1], [0, 0, 1, 1], [], []>} : vector<2x42xf32>, vector<42x64xf32>, vector<2x64xf32> -> vector<2x64xf32>
    %c0_3 = arith.constant 0 : index
    %c0_4 = arith.constant 0 : index
    %3 = vector.load %arg4[%c0_3, %c0_4] : memref<1x64xf32, #tpu.memory_space<vmem>>, vector<1x64xf32>
    %4 = vector.broadcast %3 : vector<1x64xf32> to vector<2x64xf32>
    %5 = arith.addf %2, %4 : vector<2x64xf32>
    %cst_5 = arith.constant 0.000000e+00 : f32
    %6 = vector.broadcast %cst_5 : f32 to vector<2x64xf32>
    %7 = arith.maximumf %5, %6 : vector<2x64xf32>
    %c0_6 = arith.constant 0 : index
    %c0_7 = arith.constant 0 : index
    %8 = vector.load %arg5[%c0_6, %c0_7] : memref<64x64xf32, #tpu.memory_space<vmem>>, vector<64x64xf32>
    %cst_8 = arith.constant dense<0.000000e+00> : vector<2x64xf32>
    %9 = tpu.matmul %7, %8, %cst_8 {dimension_numbers = #tpu.dot_dimension_numbers<[1], [0], [0], [1], [0, 0, 1, 1], [], []>} : vector<2x64xf32>, vector<64x64xf32>, vector<2x64xf32> -> vector<2x64xf32>
    %c0_9 = arith.constant 0 : index
    %c0_10 = arith.constant 0 : index
    %10 = vector.load %arg6[%c0_9, %c0_10] : memref<1x64xf32, #tpu.memory_space<vmem>>, vector<1x64xf32>
    %11 = vector.broadcast %10 : vector<1x64xf32> to vector<2x64xf32>
    %12 = arith.addf %9, %11 : vector<2x64xf32>
    %cst_11 = arith.constant 0.000000e+00 : f32
    %13 = vector.broadcast %cst_11 : f32 to vector<2x64xf32>
    %14 = arith.maximumf %12, %13 : vector<2x64xf32>
    %c0_12 = arith.constant 0 : index
    %c0_13 = arith.constant 0 : index
    %15 = vector.load %arg7[%c0_12, %c0_13] : memref<64x64xf32, #tpu.memory_space<vmem>>, vector<64x64xf32>
    %cst_14 = arith.constant dense<0.000000e+00> : vector<2x64xf32>
    %16 = tpu.matmul %14, %15, %cst_14 {dimension_numbers = #tpu.dot_dimension_numbers<[1], [0], [0], [1], [0, 0, 1, 1], [], []>} : vector<2x64xf32>, vector<64x64xf32>, vector<2x64xf32> -> vector<2x64xf32>
    %c0_15 = arith.constant 0 : index
    %c0_16 = arith.constant 0 : index
    %17 = vector.load %arg8[%c0_15, %c0_16] : memref<1x64xf32, #tpu.memory_space<vmem>>, vector<1x64xf32>
    %18 = vector.broadcast %17 : vector<1x64xf32> to vector<2x64xf32>
    %19 = arith.addf %16, %18 : vector<2x64xf32>
    %cst_17 = arith.constant 0.000000e+00 : f32
    %20 = vector.broadcast %cst_17 : f32 to vector<2x64xf32>
    %21 = arith.maximumf %19, %20 : vector<2x64xf32>
    %c0_18 = arith.constant 0 : index
    %c0_19 = arith.constant 0 : index
    %22 = vector.load %arg9[%c0_18, %c0_19] : memref<64x8xf32, #tpu.memory_space<vmem>>, vector<64x8xf32>
    %cst_20 = arith.constant dense<0.000000e+00> : vector<2x8xf32>
    %23 = tpu.matmul %21, %22, %cst_20 {dimension_numbers = #tpu.dot_dimension_numbers<[1], [0], [0], [1], [0, 0, 1, 1], [], []>} : vector<2x64xf32>, vector<64x8xf32>, vector<2x8xf32> -> vector<2x8xf32>
    %c0_21 = arith.constant 0 : index
    %c0_22 = arith.constant 0 : index
    %24 = vector.load %arg2[%c0_21, %c0_22] : memref<2x768xf32, #tpu.memory_space<vmem>>, vector<2x768xf32>
    %c0_23 = arith.constant 0 : index
    %c0_24 = arith.constant 0 : index
    %25 = vector.load %arg10[%c0_23, %c0_24] : memref<768x8xf32, #tpu.memory_space<vmem>>, vector<768x8xf32>
    %cst_25 = arith.constant dense<0.000000e+00> : vector<2x8xf32>
    %26 = tpu.matmul %24, %25, %cst_25 {dimension_numbers = #tpu.dot_dimension_numbers<[1], [0], [0], [1], [0, 0, 1, 1], [], []>} : vector<2x768xf32>, vector<768x8xf32>, vector<2x8xf32> -> vector<2x8xf32>
    %27 = arith.addf %23, %26 : vector<2x8xf32>
    %c0_26 = arith.constant 0 : index
    %c0_27 = arith.constant 0 : index
    %28 = vector.load %arg11[%c0_26, %c0_27] : memref<1x8xf32, #tpu.memory_space<vmem>>, vector<1x8xf32>
    %29 = vector.broadcast %28 : vector<1x8xf32> to vector<2x8xf32>
    %30 = arith.addf %27, %29 : vector<2x8xf32>
    %cst_28 = arith.constant dense<0xFF800000> : vector<2xf32>
    %31 = vector.multi_reduction <maximumf>, %30, %cst_28 [1] : vector<2x8xf32> to vector<2xf32>
    %32 = vector.shape_cast %31 : vector<2xf32> to vector<2x1xf32>
    %33 = vector.broadcast %32 : vector<2x1xf32> to vector<2x8xf32>
    %34 = arith.subf %30, %33 : vector<2x8xf32>
    %35 = math.exp %34 : vector<2x8xf32>
    %cst_29 = arith.constant dense<0.000000e+00> : vector<2xf32>
    %36 = vector.multi_reduction <add>, %35, %cst_29 [1] : vector<2x8xf32> to vector<2xf32>
    %37 = vector.shape_cast %36 : vector<2xf32> to vector<2x1xf32>
    %38 = tpu.reciprocal %37 {approx = true} : vector<2x1xf32> -> vector<2x1xf32>
    %39 = vector.broadcast %38 : vector<2x1xf32> to vector<2x8xf32>
    %40 = arith.mulf %35, %39 : vector<2x8xf32>
    %c0_30 = arith.constant 0 : index
    %c0_31 = arith.constant 0 : index
    %41 = vector.load %arg12[%c0_30, %c0_31] : memref<2x8xf32, #tpu.memory_space<vmem>>, vector<2x8xf32>
    tpu.vector_store %arg12[%c0_30, %c0_31], %40 {strides = array<i32>} : memref<2x8xf32, #tpu.memory_space<vmem>>, vector<2x8xf32>,
    return
  }
  func.func @transform_0(%arg0: i32) -> (i32, i32) {
    %c0_i32 = arith.constant 0 : i32
    %c0_i32_0 = arith.constant 0 : i32
    return %arg0, %c0_i32 : i32, i32
  }
  func.func @transform_1(%arg0: i32) -> (i32, i32) {
    %c0_i32 = arith.constant 0 : i32
    %c0_i32_0 = arith.constant 0 : i32
    return %arg0, %c0_i32 : i32, i32
  }
  func.func @transform_2(%arg0: i32) -> (i32, i32) {
    %c0_i32 = arith.constant 0 : i32
    %c0_i32_0 = arith.constant 0 : i32
    %c0_i32_1 = arith.constant 0 : i32
    return %c0_i32, %c0_i32_0 : i32, i32
  }
  func.func @transform_3(%arg0: i32) -> (i32, i32) {
    %c0_i32 = arith.constant 0 : i32
    %c0_i32_0 = arith.constant 0 : i32
    %c0_i32_1 = arith.constant 0 : i32
    return %c0_i32, %c0_i32_0 : i32, i32
  }
  func.func @transform_4(%arg0: i32) -> (i32, i32) {
    %c0_i32 = arith.constant 0 : i32
    %c0_i32_0 = arith.constant 0 : i32
    %c0_i32_1 = arith.constant 0 : i32
    return %c0_i32, %c0_i32_0 : i32, i32
  }
  func.func @transform_5(%arg0: i32) -> (i32, i32) {
    %c0_i32 = arith.constant 0 : i32
    %c0_i32_0 = arith.constant 0 : i32
    %c0_i32_1 = arith.constant 0 : i32
    return %c0_i32, %c0_i32_0 : i32, i32
  }
  func.func @transform_6(%arg0: i32) -> (i32, i32) {
    %c0_i32 = arith.constant 0 : i32
    %c0_i32_0 = arith.constant 0 : i32
    %c0_i32_1 = arith.constant 0 : i32
    return %c0_i32, %c0_i32_0 : i32, i32
  }
  func.func @transform_7(%arg0: i32) -> (i32, i32) {
    %c0_i32 = arith.constant 0 : i32
    %c0_i32_0 = arith.constant 0 : i32
    %c0_i32_1 = arith.constant 0 : i32
    return %c0_i32, %c0_i32_0 : i32, i32
  }
  func.func @transform_8(%arg0: i32) -> (i32, i32) {
    %c0_i32 = arith.constant 0 : i32
    %c0_i32_0 = arith.constant 0 : i32
    %c0_i32_1 = arith.constant 0 : i32
    return %c0_i32, %c0_i32_0 : i32, i32
  }
  func.func @transform_9(%arg0: i32) -> (i32, i32) {
    %c0_i32 = arith.constant 0 : i32
    %c0_i32_0 = arith.constant 0 : i32
    %c0_i32_1 = arith.constant 0 : i32
    return %c0_i32, %c0_i32_0 : i32, i32
  }
  func.func @transform_10(%arg0: i32) -> (i32, i32) {
    %c0_i32 = arith.constant 0 : i32
    %c0_i32_0 = arith.constant 0 : i32
    %c0_i32_1 = arith.constant 0 : i32
    return %c0_i32, %c0_i32_0 : i32, i32
  }
  func.func @transform_11(%arg0: i32) -> (i32, i32) {
    %c0_i32 = arith.constant 0 : i32
    %c0_i32_0 = arith.constant 0 : i32
    return %arg0, %c0_i32 : i32, i32
  }
}

</mosaic_0001>

<bundles_post_ra>
// kernel: tpu_custom_call.1
= control target key start
LH: loop header
LB: loop body
LE: loop exit
PB: predicated region body
PF: predicated region fallthrough
CT: control target
= control target key end

     0   :  { %v1166_v3 = vmov 0.0|0.0   ;;  %vm1167_vm0 = vmmov 0   ;;  %v1168_v6 = vmov 0.0   ;;  %vm57_vm1 = vcmask 1041408   ;;  %s1677_s0 = inlined_call_operand.vmem [shape: f32[2,42], index: 0, kind: input, shape index: {}]   ;;  %s1678_s1 = inlined_call_operand.vmem [shape: f32[2,768], index: 1, kind: input, shape index: {}]   ;;  %s1679_s2 = inlined_call_operand.vmem [shape: f32[42,64], index: 2, kind: input, shape index: {}]   ;;  %s1680_s3 = inlined_call_operand.vmem [shape: f32[1,64], index: 3, kind: input, shape index: {}]   ;;  %s1681_s4 = inlined_call_operand.vmem [shape: f32[64,64], index: 4, kind: input, shape index: {}]   ;;  %s1682_s5 = inlined_call_operand.vmem [shape: f32[1,64], index: 5, kind: input, shape index: {}]   ;;  %s1683_s6 = inlined_call_operand.vmem [shape: f32[64,64], index: 6, kind: input, shape index: {}]   ;;  %s1684_s7 = inlined_call_operand.vmem [shape: f32[1,64], index: 7, kind: input, shape index: {}]   ;;  %s1685_s8 = inlined_call_operand.vmem [shape: f32[64,8], index: 8, kind: input, shape index: {}]   ;;  %s1686_s9 = inlined_call_operand.vmem [shape: f32[768,8], index: 9, kind: input, shape index: {}]   ;;  %s1687_s10 = inlined_call_operand.vmem [shape: f32[1,8], index: 10, kind: input, shape index: {}]   ;;  %s1688_s11 = inlined_call_operand.hbm [shape: f32[2,8], index: 11, kind: output, shape index: {}]  }
   0x1   :  { %v40_v0 = vld [vmem:[%s1679_s2] sm:$0xff]  ;;  %v41_v1 = vld [vmem:[%s1679_s2 + $0x8] sm:$0xff]  ;;  %v42_v2 = vld [vmem:[%s1679_s2 + $0x10] sm:$0xff]  ;;  %989 = vmatprep.subr.bf16.mxu0 %v1166_v3  ;;  %999 = vmatprep.subr.bf16.mxu1 %v1166_v3 }
   0x2   :  { %v990_v4 = vpack.c.bf16 %v41_v1, %v40_v0  ;;  %v43_v5 = vld [vmem:[%s1679_s2 + $0x18] sm:$0xff]  ;;  %929 = vmatprep.mubr.msk.f32.mxu0 %vm1167_vm0, %v1168_v6  ;;  %v132_v7 = vld [vmem:[%s1681_s4] sm:$0xff]  ;;  %948 = vmatprep.mubr.msk.f32.mxu1 %vm1167_vm0, %v1168_v6  ;;  %v133_v9 = vld [vmem:[%s1681_s4 + $0x8] sm:$0xff] }
   0x3   :  { %v993_v8 = vpack.c.bf16 %v43_v5, %v42_v2  ;;  %v134_v10 = vld [vmem:[%s1681_s4 + $0x10] sm:$0xff]  ;;  %v135_v11 = vld [vmem:[%s1681_s4 + $0x18] sm:$0xff]  ;;  %v44_v12 = vld [vmem:[%s1679_s2 + $0x20] sm:$0xff]  ;;  %v1000_v14 = vpack.c.bf16 %v133_v9, %v132_v7 }
   0x4   :  { %991 = vmatpush3.bf16.msra.mxu0 %v990_v4  ;;  %v45_v13 = vld [vmem:[%s1679_s2 + $0x28] sm:$0x3] }
   0x5   :  { %992 = vmatprep.subr.bf16.mxu0 %v1166_v3 }
   0x6   :  { %16 = vsyncpa [#allocation3], 0  ;;  %1001 = vmatpush3.bf16.msra.mxu1 %v1000_v14  ;;  %v1003_v15 = vpack.c.bf16 %v135_v11, %v134_v10  ;;  %v996_v16 = vpack.c.bf16 %v45_v13, %v44_v12  ;;  %v136_v17 = vld [vmem:[%s1681_s4 + $0x20] sm:$0xff]  ;;  %v137_v18 = vld [vmem:[%s1681_s4 + $0x28] sm:$0xff]  ;;  %vm1169_vm2 = vmmov 1   ;;  %vm53_vm4 = vcmask 343040  }
   0x7   :  { %1002 = vmatprep.subr.bf16.mxu1 %v1166_v3  ;;  %vm997_vm3 = vmpackc.low %vm57_vm1, %vm1169_vm2  ;;  %v1006_v19 = vpack.c.bf16 %v137_v18, %v136_v17  ;;  %v39_v20 = vld [vmem:[%s1677_s0] sm:$0x3]  ;;  %v138_v21 = vld [vmem:[%s1681_s4 + $0x30] sm:$0xff]  ;;  %vm147_vm5 = vcmask 523264   ;;  %v423_v48 = vlaneseq  ;;  %v1170_v54 = vmov 1983009808  }
   0x8   :  { %994 = vmatpush3.bf16.msra.mxu0 %v993_v8  ;;  %v139_v22 = vld [vmem:[%s1681_s4 + $0x38] sm:$0xff]  ;;  %v222_v24 = vld [vmem:[%s1683_s6] sm:$0xff]  ;;  %v223_v25 = vld [vmem:[%s1683_s6 + $0x8] sm:$0xff]  ;;  %v421_v55 = vunpack.c.l.s4 %v1170_v54  ;;  %vm741_vm6 = vcmask 58368  }
   0x9   :  { %995 = vmatprep.subr.bf16.mxu0 %v1166_v3  ;;  %v1009_v23 = vpack.c.bf16 %v139_v22, %v138_v21  ;;  %v224_v26 = vld [vmem:[%s1683_s6 + $0x10] sm:$0xff]  ;;  %v1012_v27 = vpack.c.bf16 %v223_v25, %v222_v24  ;;  %v225_v28 = vld [vmem:[%s1683_s6 + $0x18] sm:$0xff]  ;;  %v226_v30 = vld [vmem:[%s1683_s6 + $0x20] sm:$0xff]  ;;  %v424_v62 = vshrl.u32 %v423_v48, 7 }
   0xa   :  { %1004 = vmatpush3.bf16.msra.mxu1 %v1003_v15  ;;  %v1015_v29 = vpack.c.bf16 %v225_v28, %v224_v26  ;;  %v227_v31 = vld [vmem:[%s1683_s6 + $0x28] sm:$0xff]  ;;  %v768_v33 = vld [vmem:[%s1680_s3] ss:$0 sm:$0xff]  ;;  %v228_v38 = vld [vmem:[%s1683_s6 + $0x30] sm:$0xff]  ;;  %v422_v61 = vunpack.c.0.s8 %v421_v55 }
   0xb   :  { %1005 = vmatprep.subr.bf16.mxu1 %v1166_v3  ;;  %v1018_v32 = vpack.c.bf16 %v227_v31, %v226_v30  ;;  %v229_v39 = vld [vmem:[%s1683_s6 + $0x38] sm:$0xff]  ;;  %v337_v41 = vld [vmem:[%s1686_s9 + $0x80] sm:$0xff]  ;;  %v338_v42 = vld [vmem:[%s1686_s9 + $0x88] sm:$0xff] }
   0xc   :  { %998 = vmatpush3.bf16.msk.msra.mxu0 %vm997_vm3, %v996_v16  ;;  %v1021_v40 = vpack.c.bf16 %v229_v39, %v228_v38  ;;  %v321_v43 = vld [vmem:[%s1686_s9] sm:$0xff]  ;;  %v1023_v44 = vpack.c.bf16 %v338_v42, %v337_v41  ;;  %v322_v45 = vld [vmem:[%s1686_s9 + $0x8] sm:$0xff]  ;;  %v339_v46 = vld [vmem:[%s1686_s9 + $0x90] sm:$0xff]  ;;  %v425_v7 = vsub.s32 %v422_v61, %v424_v62 }
   0xd   :  { %1011 = vmatprep.subr.bf16.mxu0 %v1166_v3  ;;  %v340_v47 = vld [vmem:[%s1686_s9 + $0x98] sm:$0xff]  ;;  %v1025_v49 = vpack.c.bf16 %v322_v45, %v321_v43  ;;  %v323_v51 = vld [vmem:[%s1686_s9 + $0x10] sm:$0xff]  ;;  %v341_v53 = vld [vmem:[%s1686_s9 + $0xa0] sm:$0xff] }
   0xe   :  { %1007 = vmatpush3.bf16.msra.mxu1 %v1006_v19  ;;  %v1027_v50 = vpack.c.bf16 %v340_v47, %v339_v46  ;;  %v324_v52 = vld [vmem:[%s1686_s9 + $0x18] sm:$0xff]  ;;  %v342_v56 = vld [vmem:[%s1686_s9 + $0xa8] sm:$0xff]  ;;  %v325_v59 = vld [vmem:[%s1686_s9 + $0x20] sm:$0xff] }
   0xf   :  { %930 = vmatmul.mubr.msk.f32.vlgmr.msra.gmra.mrb[0].mxu0 %vm53_vm4, %v39_v20  ;;  %1008 = vmatprep.subr.bf16.mxu1 %v1166_v3  ;;  %v1029_v57 = vpack.c.bf16 %v324_v52, %v323_v51  ;;  %v1031_v58 = vpack.c.bf16 %v342_v56, %v341_v53  ;;  %v326_v60 = vld [vmem:[%s1686_s9 + $0x28] sm:$0xff]  ;;  %v343_v63 = vld [vmem:[%s1686_s9 + $0xb0] sm:$0xff]  ;;  %v344_v0 = vld [vmem:[%s1686_s9 + $0xb8] sm:$0xff] }
  0x10   :  { %967 = vmatprep.mubr.msk.f32.mxu0 %vm1167_vm0, %v1168_v6  ;;  %1013 = vmatpush3.bf16.msra.mxu0 %v1012_v27  ;;  %v1033_v1 = vpack.c.bf16 %v326_v60, %v325_v59  ;;  %v1035_v2 = vpack.c.bf16 %v344_v0, %v343_v63  ;;  %v327_v4 = vld [vmem:[%s1686_s9 + $0x30] sm:$0xff]  ;;  %v328_v5 = vld [vmem:[%s1686_s9 + $0x38] sm:$0xff]  ;;  %v345_v8 = vld [vmem:[%s1686_s9 + $0xc0] sm:$0xff] }
  0x11   :  { %1014 = vmatprep.subr.bf16.mxu0 %v1166_v3  ;;  %v346_v9 = vld [vmem:[%s1686_s9 + $0xc8] sm:$0xff]  ;;  %v369_v10 = vld [vmem:[%s1686_s9 + $0x180] sm:$0xff]  ;;  %v1037_v12 = vpack.c.bf16 %v328_v5, %v327_v4  ;;  %v347_v19 = vld [vmem:[%s1686_s9 + $0xd0] sm:$0xff] }
  0x12   :  { %1010 = vmatpush3.bf16.msra.mxu1 %v1009_v23  ;;  %v370_v11 = vld [vmem:[%s1686_s9 + $0x188] sm:$0xff]  ;;  %v319_v14 = vld [vmem:[%s1678_s1] sm:$0xff]  ;;  %v1039_v15 = vpack.c.bf16 %v346_v9, %v345_v8  ;;  %v348_v20 = vld [vmem:[%s1686_s9 + $0xd8] sm:$0xff] }
  0x13   :  { %1024 = vmatprep.subr.bf16.mxu1 %v1023_v44  ;;  %v1055_v13 = vpack.c.bf16 %v370_v11, %v369_v10  ;;  %v329_v16 = vld [vmem:[%s1686_s9 + $0x40] sm:$0xff]  ;;  %v330_v17 = vld [vmem:[%s1686_s9 + $0x48] sm:$0xff]  ;;  %v426_v18 = vrot.slane %v319_v14, %v425_v7  ;;  %v1043_v23 = vpack.c.bf16 %v348_v20, %v347_v19  ;;  %v331_v24 = vld [vmem:[%s1686_s9 + $0x50] sm:$0xff]  ;;  %v419_v44 = vcombine.high %v319_v14, %v319_v14 }
  0x14   :  { %1016 = vmatpush3.bf16.msra.mxu0 %v1015_v29  ;;  %v1041_v22 = vpack.c.bf16 %v330_v17, %v329_v16  ;;  %v332_v25 = vld [vmem:[%s1686_s9 + $0x58] sm:$0xff]  ;;  %v349_v26 = vld [vmem:[%s1686_s9 + $0xe0] sm:$0xff]  ;;  %v350_v27 = vld [vmem:[%s1686_s9 + $0xe8] sm:$0xff] }
  0x15   :  { %1017 = vmatprep.subr.bf16.mxu0 %v1166_v3  ;;  %v434_v21 = vcombine.high %v426_v18, %v426_v18  ;;  %v1045_v28 = vpack.c.bf16 %v332_v25, %v331_v24  ;;  %v1047_v29 = vpack.c.bf16 %v350_v27, %v349_v26  ;;  %v333_v30 = vld [vmem:[%s1686_s9 + $0x60] sm:$0xff]  ;;  %v334_v31 = vld [vmem:[%s1686_s9 + $0x68] sm:$0xff]  ;;  %v403_v45 = vld [vmem:[%s1686_s9 + $0x290] sm:$0xff]  ;;  %v1445_v47 = vrot.slane %v419_v44, %v425_v7 }
  0x16   :  { %v401_v38 = vld [vmem:[%s1686_s9 + $0x280] sm:$0xff]  ;;  %v402_v39 = vld [vmem:[%s1686_s9 + $0x288] sm:$0xff]  ;;  %v404_v46 = vld [vmem:[%s1686_s9 + $0x298] sm:$0xff] }
  0x17   :  { %v1087_v41 = vpack.c.bf16 %v402_v39, %v401_v38  ;;  %v385_v42 = vld [vmem:[%s1686_s9 + $0x200] sm:$0xff]  ;;  %v386_v43 = vld [vmem:[%s1686_s9 + $0x208] sm:$0xff]  ;;  %v387_v51 = vld [vmem:[%s1686_s9 + $0x210] sm:$0xff]  ;;  %v435_v38 = vcombine.high %v1445_v47, %v1445_v47 }
  0x18   :  { %1019 = vmatpush3.bf16.msra.mxu0 %v1018_v32  ;;  %v351_v32 = vld [vmem:[%s1686_s9 + $0xf0] sm:$0xff]  ;;  %v1089_v48 = vpack.c.bf16 %v386_v43, %v385_v42  ;;  %v388_v52 = vld [vmem:[%s1686_s9 + $0x218] sm:$0xff]  ;;  %v405_v54 = vld [vmem:[%s1686_s9 + $0x2a0] sm:$0xff] }
  0x19   :  { %1020 = vmatprep.subr.bf16.mxu0 %v1166_v3  ;;  %v406_v55 = vld [vmem:[%s1686_s9 + $0x2a8] sm:$0xff]  ;;  %v1093_v56 = vpack.c.bf16 %v388_v52, %v387_v51  ;;  %v407_v60 = vld [vmem:[%s1686_s9 + $0x2b0] sm:$0xff]  ;;  %v408_v61 = vld [vmem:[%s1686_s9 + $0x2b8] sm:$0xff] }
  0x1a   :  { %v390_v59 = vld [vmem:[%s1686_s9 + $0x228] sm:$0xff]  ;;  %v1099_v63 = vpack.c.bf16 %v408_v61, %v407_v60  ;;  %v391_v0 = vld [vmem:[%s1686_s9 + $0x230] sm:$0xff]  ;;  %v393_v8 = vld [vmem:[%s1686_s9 + $0x240] sm:$0xff] }
  0x1b   :  { %v410_v4 = vld [vmem:[%s1686_s9 + $0x2c8] sm:$0xff]  ;;  %v411_v10 = vld [vmem:[%s1686_s9 + $0x2d0] sm:$0xff]  ;;  %v412_v11 = vld [vmem:[%s1686_s9 + $0x2d8] sm:$0xff] }
  0x1c   :  { %1022 = vmatpush3.bf16.msra.mxu0 %v1021_v40  ;;  %v394_v9 = vld [vmem:[%s1686_s9 + $0x248] sm:$0xff]  ;;  %v395_v14 = vld [vmem:[%s1686_s9 + $0x250] sm:$0xff]  ;;  %v413_v16 = vld [vmem:[%s1686_s9 + $0x2e0] sm:$0xff] }
  0x1d   :  { %1056 = vmatprep.subr.bf16.mxu0 %v1055_v13  ;;  %v1107_v13 = vpack.c.bf16 %v412_v11, %v411_v10  ;;  %v414_v17 = vld [vmem:[%s1686_s9 + $0x2e8] sm:$0xff]  ;;  %v397_v20 = vld [vmem:[%s1686_s9 + $0x260] sm:$0xff]  ;;  %v399_v26 = vld [vmem:[%s1686_s9 + $0x270] sm:$0xff] }
  0x1e   :  { %v1111_v19 = vpack.c.bf16 %v414_v17, %v413_v16  ;;  %v400_v27 = vld [vmem:[%s1686_s9 + $0x278] sm:$0xff]  ;;  %v373_v43 = vld [vmem:[%s1686_s9 + $0x1a0] sm:$0xff]  ;;  %v374_v44 = vld [vmem:[%s1686_s9 + $0x1a8] sm:$0xff] }
  0x1f   :  { %v356_v42 = vld [vmem:[%s1686_s9 + $0x118] sm:$0xff]  ;;  %v361_v60 = vld [vmem:[%s1686_s9 + $0x140] sm:$0xff]  ;;  %v362_v61 = vld [vmem:[%s1686_s9 + $0x148] sm:$0xff] }
  0x20   :  { %v376_v51 = vld [vmem:[%s1686_s9 + $0x1b8] sm:$0xff]  ;;  %v365_v10 = vld [vmem:[%s1686_s9 + $0x160] sm:$0xff]  ;;  %v366_v11 = vld [vmem:[%s1686_s9 + $0x168] sm:$0xff] }
  0x21   :  { %v367_v16 = vld [vmem:[%s1686_s9 + $0x170] sm:$0xff]  ;;  %v368_v17 = vld [vmem:[%s1686_s9 + $0x178] sm:$0xff] }
  0xe2   :  { %v127_v34 = vpop.f32.mrb[0].mxu0 }
  0xe3   :  { %v128_v35 = vadd.f32 %v768_v33, %v127_v34  ;;  %v931_v36 = vpop.f32.mrb[1].mxu0  ;;  %v352_v33 = vld [vmem:[%s1686_s9 + $0xf8] sm:$0xff]  ;;  %v1049_v34 = vpack.c.bf16 %v334_v31, %v333_v30  ;;  %v353_v30 = vld [vmem:[%s1686_s9 + $0x100] sm:$0xff]  ;;  %v354_v31 = vld [vmem:[%s1686_s9 + $0x108] sm:$0xff] }
  0xe4   :  { %v335_v36 = vld [vmem:[%s1686_s9 + $0x70] sm:$0xff] }
  0xe5   :  { %v131_v37 = vmax.f32 %v128_v35, 0.0  ;;  %v1051_v35 = vpack.c.bf16 %v352_v33, %v351_v32  ;;  %v371_v33 = vld [vmem:[%s1686_s9 + $0x190] sm:$0xff] }
  0xe7   :  { %949 = vmatmul.mubr.msk.f32.vlgmr.msra.gmra.mrb[0].mxu1 %vm147_vm5, %v131_v37  ;;  %v336_v37 = vld [vmem:[%s1686_s9 + $0x78] sm:$0xff] }
  0xe8   :  { %1026 = vmatpush3.bf16.msra.mxu1 %v1025_v49  ;;  %514 = vmatprep.mubr.f32.mxu1 %v434_v21  ;;  %v1053_v40 = vpack.c.bf16 %v336_v37, %v335_v36  ;;  %v775_v49 = vld.sshfl [vmem:[%s1678_s1 + $0x8] sm:$0x33 pattern:$0x76325410]  ;;  %v1057_v37 = vpack.c.bf16 %v354_v31, %v353_v30 }
  0xe9   :  { %1028 = vmatprep.subr.bf16.mxu1 %v1027_v50  ;;  %v1091_v50 = vpack.c.bf16 %v404_v46, %v403_v45  ;;  %v443_v53 = vcombine.high %v775_v49, %v775_v49  ;;  %v398_v21 = vld [vmem:[%s1686_s9 + $0x268] sm:$0xff]  ;;  %v1063_v46 = vpack.c.bf16 %v374_v44, %v373_v43 }
  0xea   :  { %v1113_v24 = vpack.c.bf16 %v398_v21, %v397_v20  ;;  %v312_v20 = vld [vmem:[%s1685_s8 + $0x8] sm:$0xff] }
  0xec   :  { %1030 = vmatpush3.bf16.msra.mxu1 %v1029_v57  ;;  %v1095_v57 = vpack.c.bf16 %v406_v55, %v405_v54  ;;  %v359_v54 = vld [vmem:[%s1686_s9 + $0x130] sm:$0xff]  ;;  %v360_v55 = vld [vmem:[%s1686_s9 + $0x138] sm:$0xff] }
  0xed   :  { %1032 = vmatprep.subr.bf16.mxu1 %v1031_v58  ;;  %v389_v58 = vld [vmem:[%s1686_s9 + $0x220] sm:$0xff] }
  0xee   :  { %v1097_v62 = vpack.c.bf16 %v390_v59, %v389_v58  ;;  %v1069_v58 = vpack.c.bf16 %v360_v55, %v359_v54 }
  0xf0   :  { %1034 = vmatpush3.bf16.msra.mxu1 %v1033_v1  ;;  %v392_v1 = vld [vmem:[%s1686_s9 + $0x238] sm:$0xff] }
  0xf1   :  { %1036 = vmatprep.subr.bf16.mxu1 %v1035_v2  ;;  %v409_v2 = vld [vmem:[%s1686_s9 + $0x2c0] sm:$0xff]  ;;  %v1101_v5 = vpack.c.bf16 %v392_v1, %v391_v0  ;;  %v1073_v0 = vpack.c.bf16 %v362_v61, %v361_v60 }
  0xf2   :  { %v1103_v7 = vpack.c.bf16 %v410_v4, %v409_v2  ;;  %v363_v2 = vld [vmem:[%s1686_s9 + $0x150] sm:$0xff]  ;;  %v364_v4 = vld [vmem:[%s1686_s9 + $0x158] sm:$0xff] }
  0xf4   :  { %1038 = vmatpush3.bf16.msra.mxu1 %v1037_v12  ;;  %v1105_v12 = vpack.c.bf16 %v394_v9, %v393_v8  ;;  %v1077_v8 = vpack.c.bf16 %v364_v4, %v363_v2 }
  0xf5   :  { %1040 = vmatprep.subr.bf16.mxu1 %v1039_v15  ;;  %v396_v15 = vld [vmem:[%s1686_s9 + $0x258] sm:$0xff] }
  0xf8   :  { %1042 = vmatpush3.bf16.msra.mxu1 %v1041_v22  ;;  %v415_v22 = vld [vmem:[%s1686_s9 + $0x2f0] sm:$0xff] }
  0xf9   :  { %1044 = vmatprep.subr.bf16.mxu1 %v1043_v23  ;;  %v416_v23 = vld [vmem:[%s1686_s9 + $0x2f8] sm:$0xff] }
  0xfa   :  { %v1115_v25 = vpack.c.bf16 %v416_v23, %v415_v22  ;;  %v313_v22 = vld [vmem:[%s1685_s8 + $0x10] sm:$0xff]  ;;  %v314_v23 = vld [vmem:[%s1685_s8 + $0x18] sm:$0xff] }
  0xfc   :  { %1046 = vmatpush3.bf16.msra.mxu1 %v1045_v28  ;;  %v1117_v28 = vpack.c.bf16 %v400_v27, %v399_v26  ;;  %v316_v26 = vld [vmem:[%s1685_s8 + $0x28] sm:$0xff] }
  0xfd   :  { %1048 = vmatprep.subr.bf16.mxu1 %v1047_v29  ;;  %v771_v29 = vld [vmem:[%s1682_s5] ss:$0 sm:$0xff] }
 0x100   :  { %1050 = vmatpush3.bf16.msra.mxu1 %v1049_v34  ;;  %v372_v34 = vld [vmem:[%s1686_s9 + $0x198] sm:$0xff] }
 0x101   :  { %1052 = vmatprep.subr.bf16.mxu1 %v1051_v35 }
 0x104   :  { %1054 = vmatpush3.bf16.msra.mxu1 %v1053_v40  ;;  %v1059_v40 = vpack.c.bf16 %v372_v34, %v371_v33 }
 0x105   :  { %1088 = vmatprep.subr.bf16.mxu1 %v1087_v41  ;;  %v355_v41 = vld [vmem:[%s1686_s9 + $0x110] sm:$0xff] }
 0x106   :  { %v1061_v45 = vpack.c.bf16 %v356_v42, %v355_v41 }
 0x107   :  { %515 = vmatmul.mubr.f32.vlgmr.msra.gmra.mrb[2].mxu1 %v426_v18  ;;  %v1109_v18 = vpack.c.bf16 %v396_v15, %v395_v14  ;;  %v1081_v14 = vpack.c.bf16 %v366_v11, %v365_v10 }
 0x108   :  { %1090 = vmatpush3.bf16.msra.mxu1 %v1089_v48  ;;  %654 = vmatprep.mubr.f32.mxu1 %v443_v53  ;;  %v357_v48 = vld [vmem:[%s1686_s9 + $0x120] sm:$0xff] }
 0x109   :  { %1092 = vmatprep.subr.bf16.mxu1 %v1091_v50  ;;  %v375_v50 = vld [vmem:[%s1686_s9 + $0x1b0] sm:$0xff] }
 0x10a   :  { %v1067_v53 = vpack.c.bf16 %v376_v51, %v375_v50 }
 0x10c   :  { %1094 = vmatpush3.bf16.msra.mxu1 %v1093_v56  ;;  %v377_v56 = vld [vmem:[%s1686_s9 + $0x1c0] sm:$0xff] }
 0x10d   :  { %1096 = vmatprep.subr.bf16.mxu1 %v1095_v57  ;;  %v378_v57 = vld [vmem:[%s1686_s9 + $0x1c8] sm:$0xff] }
 0x10e   :  { %v1071_v59 = vpack.c.bf16 %v378_v57, %v377_v56 }
 0x110   :  { %1098 = vmatpush3.bf16.msra.mxu1 %v1097_v62  ;;  %v379_v62 = vld [vmem:[%s1686_s9 + $0x1d0] sm:$0xff] }
 0x111   :  { %1100 = vmatprep.subr.bf16.mxu1 %v1099_v63  ;;  %v380_v63 = vld [vmem:[%s1686_s9 + $0x1d8] sm:$0xff] }
 0x112   :  { %v1075_v1 = vpack.c.bf16 %v380_v63, %v379_v62 }
 0x114   :  { %1102 = vmatpush3.bf16.msra.mxu1 %v1101_v5  ;;  %v381_v5 = vld [vmem:[%s1686_s9 + $0x1e0] sm:$0xff] }
 0x115   :  { %1104 = vmatprep.subr.bf16.mxu1 %v1103_v7  ;;  %v382_v7 = vld [vmem:[%s1686_s9 + $0x1e8] sm:$0xff] }
 0x116   :  { %v1079_v9 = vpack.c.bf16 %v382_v7, %v381_v5 }
 0x118   :  { %1106 = vmatpush3.bf16.msra.mxu1 %v1105_v12  ;;  %v383_v12 = vld [vmem:[%s1686_s9 + $0x1f0] sm:$0xff] }
 0x119   :  { %1108 = vmatprep.subr.bf16.mxu1 %v1107_v13  ;;  %v384_v13 = vld [vmem:[%s1686_s9 + $0x1f8] sm:$0xff] }
 0x11a   :  { %v1083_v15 = vpack.c.bf16 %v384_v13, %v383_v12 }
 0x11c   :  { %1110 = vmatpush3.bf16.msra.mxu1 %v1109_v18  ;;  %v1085_v18 = vpack.c.bf16 %v368_v17, %v367_v16 }
 0x11d   :  { %1112 = vmatprep.subr.bf16.mxu1 %v1111_v19  ;;  %v311_v19 = vld [vmem:[%s1685_s8] sm:$0xff] }
 0x11e   :  { %v1120_v21 = vpack.c.bf16 %v312_v20, %v311_v19 }
 0x120   :  { %1114 = vmatpush3.bf16.msra.mxu1 %v1113_v24  ;;  %v1123_v24 = vpack.c.bf16 %v314_v23, %v313_v22 }
 0x121   :  { %1116 = vmatprep.subr.bf16.mxu1 %v1115_v25  ;;  %v315_v25 = vld [vmem:[%s1685_s8 + $0x20] sm:$0xff] }
 0x122   :  { %v1126_v27 = vpack.c.bf16 %v316_v26, %v315_v25 }
 0x124   :  { %1118 = vmatpush3.bf16.msra.mxu1 %v1117_v28 }
 0x127   :  { %655 = vmatmul.mubr.f32.vlgmr.msra.gmra.mrb[4].mxu1 %v775_v49  ;;  %v358_v49 = vld [vmem:[%s1686_s9 + $0x128] sm:$0xff] }
 0x128   :  { %v1065_v52 = vpack.c.bf16 %v358_v49, %v357_v48 }
 0x1ba   :  { %v217_v32 = vpop.f32.mrb[0].mxu1 }
 0x1bb   :  { %v218_v35 = vadd.f32 %v771_v29, %v217_v32  ;;  %v950_v36 = vpop.f32.mrb[1].mxu1 }
 0x1bd   :  { %v221_v39 = vmax.f32 %v218_v35, 0.0 }
 0x1bf   :  { %968 = vmatmul.mubr.msk.f32.vlgmr.msra.gmra.mrb[2].mxu0 %vm147_vm5, %v221_v39 }
 0x1c0   :  { %1058 = vmatpush3.bf16.msra.mxu0 %v1057_v37  ;;  %584 = vmatprep.mubr.f32.mxu0 %v435_v38 }
 0x1c1   :  { %1060 = vmatprep.subr.bf16.mxu0 %v1059_v40 }
 0x1c4   :  { %1062 = vmatpush3.bf16.msra.mxu0 %v1061_v45  ;;  %v777_v45 = vld [vmem:[%s1687_s10] ss:$0 sm:$0xff] }
 0x1c5   :  { %1064 = vmatprep.subr.bf16.mxu0 %v1063_v46 }
 0x1c8   :  { %1066 = vmatpush3.bf16.msra.mxu0 %v1065_v52 }
 0x1c9   :  { %1068 = vmatprep.subr.bf16.mxu0 %v1067_v53 }
 0x1cc   :  { %1070 = vmatpush3.bf16.msra.mxu0 %v1069_v58 }
 0x1cd   :  { %1072 = vmatprep.subr.bf16.mxu0 %v1071_v59 }
 0x1d0   :  { %1074 = vmatpush3.bf16.msra.mxu0 %v1073_v0 }
 0x1d1   :  { %1076 = vmatprep.subr.bf16.mxu0 %v1075_v1 }
 0x1d4   :  { %1078 = vmatpush3.bf16.msra.mxu0 %v1077_v8 }
 0x1d5   :  { %1080 = vmatprep.subr.bf16.mxu0 %v1079_v9 }
 0x1d8   :  { %1082 = vmatpush3.bf16.msra.mxu0 %v1081_v14 }
 0x1d9   :  { %1084 = vmatprep.subr.bf16.mxu0 %v1083_v15 }
 0x1da   :  { %v835_v29 = vpop.f32.mrb[2].mxu1 }
 0x1db   :  { %v836_v30 = vpop.f32.mrb[3].mxu1 }
 0x1dc   :  { %1086 = vmatpush3.bf16.msra.mxu0 %v1085_v18  ;;  %v837_v31 = vadd.f32 %v836_v30, %v835_v29 }
 0x1dd   :  { %1119 = vmatprep.subr.bf16.mxu0 %v1166_v3 }
 0x1df   :  { %585 = vmatmul.mubr.f32.vlgmr.msra.gmra.mrb[4].mxu0 %v1445_v47  ;;  %v318_v47 = vld [vmem:[%s1685_s8 + $0x38] sm:$0xff] }
 0x1e0   :  { %1121 = vmatpush3.bf16.msra.mxu0 %v1120_v21  ;;  %986 = vmatprep.mubr.msk.f32.mxu0 %vm1167_vm0, %v1168_v6  ;;  %v317_v6 = vld [vmem:[%s1685_s8 + $0x30] sm:$0xff] }
 0x1e1   :  { %1122 = vmatprep.subr.bf16.mxu0 %v1166_v3  ;;  %v1129_v28 = vpack.c.bf16 %v318_v47, %v317_v6 }
 0x1e4   :  { %1124 = vmatpush3.bf16.msra.mxu0 %v1123_v24 }
 0x1e5   :  { %1125 = vmatprep.subr.bf16.mxu0 %v1166_v3 }
 0x1e8   :  { %1127 = vmatpush3.bf16.msra.mxu0 %v1126_v27 }
 0x1e9   :  { %1128 = vmatprep.subr.bf16.mxu0 %v1166_v3  ;;  %v773_v3 = vld [vmem:[%s1684_s7] ss:$0 sm:$0xff]  ;;  %s1171_s7 = smov [#allocation2]  }
 0x1ea   :  { %s760_s16 = sshll.u32 %s1171_s7, 4  ;;  %s761_s16 = int_to_ptr.vmem [resolvable:$true] %s760_s16 }
 0x1eb   :  { %s1142_s10 = scalar_lea.vmem %s761_s16, 32  ;;  %p1147_p1 = scmp.lt.s32.totalorder %s761_s16, %s761_s16 }
 0x1ec   :  { %1130 = vmatpush3.bf16.msra.mxu0 %v1129_v28  ;;  %p1143_p0 = scmp.ne.s32.totalorder %s761_s16, %s1142_s10  ;;  %p1148_p2 = scmp.lt.s32.totalorder %s1142_s10, %s1142_s10 }
 0x1ee   :  { %p1149_p3 = por %p1148_p2, %p1147_p1 }
 0x1f0   :  { %p1150_p4 = pnand %p1149_p3, %p1143_p0 }
 0x1fa   :  { %v905_v32 = vpop.f32.mrb[4].mxu1 }
 0x1fb   :  { %v906_v33 = vpop.f32.mrb[5].mxu1 }
 0x1fc   :  { %v907_v34 = vadd.f32 %v906_v33, %v905_v32 }
 0x292   :  { %v306_v35 = vpop.f32.mrb[2].mxu0 }
 0x293   :  { %v307_v36 = vadd.f32 %v773_v3, %v306_v35  ;;  %v969_v37 = vpop.f32.mrb[3].mxu0 }
 0x295   :  { %v310_v38 = vmax.f32 %v307_v36, 0.0 }
 0x297   :  { %987 = vmatmul.mubr.msk.f32.vlgmr.msra.gmra.mrb[6].mxu0 %vm147_vm5, %v310_v38 }
 0x2b2   :  { %v870_v39 = vpop.f32.mrb[4].mxu0 }
 0x2b3   :  { %v871_v40 = vpop.f32.mrb[5].mxu0 }
 0x2b4   :  { %v872_v41 = vadd.f32 %v871_v40, %v870_v39 }
 0x2b6   :  { %v587_v42 = vadd.f32 %v872_v41, %v837_v31 }
 0x2b8   :  { %v657_v43 = vadd.f32 %v907_v34, %v587_v42 }
 0x36a   :  { %v729_v44 = vpop.f32.mrb[6].mxu0 }
 0x36b   :  { %v730_v46 = vadd.f32 %v729_v44, %v657_v43  ;;  %v988_v48 = vpop.f32.mrb[7].mxu0 }
 0x36d   :  { %v740_v49 = vadd.f32 %v777_v45, %v730_v46 }
 0x36f   :  { %v742_v50 = vsel %vm741_vm6, %v740_v49, -inf }
 0x370   :  { %743 = vmax.xlane.f32.xlu0 %v742_v50 }
 0x3fd   :  { %v744_v51 = vpop.xlane.xlu0 %743 }
 0x3fe   :  { %v745_v52 = vsub.f32 %v740_v49, %v744_v51 }
 0x400   :  { %v746_v53 = vmul.f32 1.442695, %v745_v52 }
 0x402   :  { %1138 = vpow2.f32 %v746_v53 }
 0x40c   :  { %v1139_v54 = vpop.eup %1138 }
 0x40d   :  { %v748_v55 = vsel %vm741_vm6, %v1139_v54, 0.0 }
 0x40e   :  { %749 = vadd.xlane.f32.xlu0 %v748_v55 }
 0x49b   :  { %v750_v56 = vpop.xlane.xlu0 %749 }
 0x49c   :  { %1140 = vrcp.f32 %v750_v56 }
 0x4a6   :  { %v1141_v57 = vpop.eup %1140 }
 0x4a7   :  { %v752_v58 = vmul.f32 %v1141_v57, %v1139_v54 }
 0x4a9   :  { %753 = vst.msk [vmem:[#allocation2] sm:$0x3] %vm741_vm6, %v752_v58 }
 0x4aa   :  { %1153 = shalt.err (!%p1150_p4)
}
 0x4ab   :  { %s1154_s19 = scalar_lea.hbm %s1688_s11, 32 }
 0x4ac   :  { %p1155_p5 = scmp.ne.s32.totalorder %s1688_s11, %s1154_s19  ;;  %p1158_p6 = scmp.lt.u32.totalorder %s1154_s19, %s1688_s11 }
 0x4ae   :  { %p1160_p7 = pnand %p1158_p6, %p1155_p5 }
 0x4b0   :  { %1163 = shalt.err (!%p1160_p7)
}
 0x4b1   :  { %763 = dma.vmem_to_hbm [thread:$0]  %s761_s16, 32, %s1688_s11, [#allocation3]  }
 0x4b2   :  { %1164 = dma.done.wait [#allocation3], 32  }
 0x4b3   :  { %1165 = vsyncadd [#allocation3], 4294967264 }
 0x4b4   :  { %767 = vsyncpa [#allocation3], 1 }

</bundles_post_ra>
